<compile_context>
chip_gen: v5e
topology: v5e:2x2
jax: 0.10.0
libtpu: 0.0.40
codegen_flags: <defaults>
</compile_context>

<pallas_src>
import functools
import math

import jax
import jax.numpy as jnp
from jax.experimental import pallas as pl
from jax.experimental.pallas import tpu as pltpu


def _gelu_new(x):
    # GPT-2 "gelu_new" (tanh approximation), matches HF ACT2FN["gelu_new"].
    # x*x*x is two VPU multiplies; jnp.power(x, 3.0) can lower to EUP exp/log.
    c = math.sqrt(2.0 / math.pi)
    return 0.5 * x * (1.0 + jnp.tanh(c * (x + 0.044715 * x * x * x)))


def _gpt2_mlp_kernel(x_ref, wfc_ref, bfc_ref, wproj_ref, bproj_ref, o_ref, acc_ref):
    j = pl.program_id(1)  # reduction step over the intermediate (I) dimension

    @pl.when(j == 0)
    def _():
        acc_ref[...] = jnp.zeros_like(acc_ref)

    # c_fc partial: [tm, H] @ [H, ti] on the MXU with f32 accumulation.
    h = jnp.dot(x_ref[...], wfc_ref[...], preferred_element_type=jnp.float32)
    # bias + gelu_new in f32 (elementwise over I, so per-I-tile is exact).
    h = _gelu_new(h + bfc_ref[...])

    # c_proj partial: [tm, ti] @ [ti, H], accumulated into the f32 scratch.
    acc_ref[...] += jnp.dot(h.astype(wproj_ref.dtype), wproj_ref[...],
                            preferred_element_type=jnp.float32)

    # Epilogue: add output bias and cast exactly once per output tile.
    @pl.when(j == pl.num_programs(1) - 1)
    def _():
        o_ref[...] = (acc_ref[...] + bproj_ref[...]).astype(o_ref.dtype)


def _round_up(x, m):
    return (x + m - 1) // m * m


@functools.partial(jax.jit,
                   static_argnames=("block_m", "block_i", "compute_dtype"))
def gpt2_mlp(x, w_fc, b_fc, w_proj, b_proj, *,
             block_m=256, block_i=512, compute_dtype=jnp.bfloat16):
    """GPT2MLP forward (c_fc -> gelu_new -> c_proj; dropout = identity in eval).

    x: [B, S, H]; w_fc: [H, I]; b_fc: [I]; w_proj: [I, H]; b_proj: [H].
    """
    B, S, H = x.shape
    I = w_fc.shape[1]
    M = B * S
    out_dtype = x.dtype

    # Row (M) tiling: pad to a tile multiple instead of hard-asserting divisibility.
    tm = min(block_m, _round_up(M, 8))
    M_pad = _round_up(M, tm)

    # Intermediate (I) tiling: reduction grid axis, bounds VMEM per step.
    if I <= block_i:
        ti, I_pad = I, I
    else:
        ti = block_i                      # multiple of 128 by construction
        I_pad = _round_up(I, ti)

    # Matmul inputs in compute_dtype (bf16 by default); biases stay f32.
    x2d = x.reshape(M, H).astype(compute_dtype)
    if M_pad != M:
        x2d = jnp.pad(x2d, ((0, M_pad - M), (0, 0)))

    w_fc_c = w_fc.astype(compute_dtype)
    w_proj_c = w_proj.astype(compute_dtype)
    b_fc2 = b_fc.astype(jnp.float32).reshape(1, I)
    b_proj2 = b_proj.astype(jnp.float32).reshape(1, H)
    if I_pad != I:
        # Zero padding is exact: gelu_new(0) == 0 and padded w_proj rows are zero.
        w_fc_c = jnp.pad(w_fc_c, ((0, 0), (0, I_pad - I)))
        w_proj_c = jnp.pad(w_proj_c, ((0, I_pad - I), (0, 0)))
        b_fc2 = jnp.pad(b_fc2, ((0, 0), (0, I_pad - I)))

    grid = (M_pad // tm, I_pad // ti)

    out2d = pl.pallas_call(
        _gpt2_mlp_kernel,
        out_shape=jax.ShapeDtypeStruct((M_pad, H), out_dtype),
        grid_spec=pltpu.PrefetchScalarGridSpec(
            num_scalar_prefetch=0,
            grid=grid,
            in_specs=[
                pl.BlockSpec((tm, H), lambda i, j: (i, 0)),   # x row tile (resident over j)
                pl.BlockSpec((H, ti), lambda i, j: (0, j)),   # W_fc  I-slab
                pl.BlockSpec((1, ti), lambda i, j: (0, j)),   # b_fc  I-slab
                pl.BlockSpec((ti, H), lambda i, j: (j, 0)),   # W_proj I-slab
                pl.BlockSpec((1, H), lambda i, j: (0, 0)),    # b_proj
            ],
            out_specs=pl.BlockSpec((tm, H), lambda i, j: (i, 0)),
            scratch_shapes=[pltpu.VMEM((tm, H), jnp.float32)],  # f32 accumulator
        ),
        compiler_params=pltpu.CompilerParams(
            dimension_semantics=("parallel", "arbitrary"),
            vmem_limit_bytes=48 * 1024 * 1024,   # fits v7x (64 MiB) and lifts v5e/v6e default
        ),
    )(x2d, w_fc_c, b_fc2, w_proj_c, b_proj2)

    return out2d[:M].reshape(B, S, H)


def _reference(x, w_fc, b_fc, w_proj, b_proj):
    h = jnp.einsum("bsh,hi->bsi", x, w_fc) + b_fc
    h = _gelu_new(h)
    return jnp.einsum("bsi,ih->bsh", h, w_proj) + b_proj


if __name__ == "__main__":
    # Small GPT-2-like config: hidden=32, intermediate=4*hidden=128, batch=2, seq=8.
    B, S, H = 2, 8, 32
    I = 4 * H

    key = jax.random.PRNGKey(0)
    kx, kwf, kbf, kwp, kbp = jax.random.split(key, 5)

    x = jax.random.normal(kx, (B, S, H), dtype=jnp.float32)
    # HF Conv1D init: weight ~ N(0, 0.02); use small normals for biases too.
    w_fc = 0.02 * jax.random.normal(kwf, (H, I), dtype=jnp.float32)
    b_fc = 0.02 * jax.random.normal(kbf, (I,), dtype=jnp.float32)
    w_proj = 0.02 * jax.random.normal(kwp, (I, H), dtype=jnp.float32)
    b_proj = 0.02 * jax.random.normal(kbp, (H,), dtype=jnp.float32)

    ref = _reference(x, w_fc, b_fc, w_proj, b_proj)

    # Default fast path: bf16 MXU inputs, f32 accumulation/epilogue.
    out_bf16 = gpt2_mlp(x, w_fc, b_fc, w_proj, b_proj)
    out_bf16 = jax.block_until_ready(out_bf16)
    assert out_bf16.shape == (B, S, H)
    assert jnp.allclose(out_bf16, ref, atol=3e-3, rtol=2e-2), "bf16 path mismatch"

    # Full-precision path for a strict numerical check of the fused kernel.
    out_f32 = gpt2_mlp(x, w_fc, b_fc, w_proj, b_proj, compute_dtype=jnp.float32)
    out_f32 = jax.block_until_ready(out_f32)
    assert jnp.allclose(out_f32, ref, atol=1e-5, rtol=1e-5), "f32 path mismatch"

    # TODO(synk): dropout (resid_pdrop) is omitted — identity in eval/inference mode.
    print("KERNEL_OK")
</pallas_src>

<mosaic_0001>
module attributes {stable_mosaic.version = 11 : i64} {
  func.func @_gpt2_mlp_kernel(%arg0: i32, %arg1: i32, %arg2: memref<16x32xbf16, #tpu.memory_space<vmem>>, %arg3: memref<32x128xbf16, #tpu.memory_space<vmem>>, %arg4: memref<1x128xf32, #tpu.memory_space<vmem>>, %arg5: memref<128x32xbf16, #tpu.memory_space<vmem>>, %arg6: memref<1x32xf32, #tpu.memory_space<vmem>>, %arg7: memref<16x32xf32, #tpu.memory_space<vmem>>, %arg8: memref<16x32xf32, #tpu.memory_space<vmem>>) attributes {dimension_semantics = [#tpu.dimension_semantics<parallel>, #tpu.dimension_semantics<arbitrary>], iteration_bounds = array<i64: 1, 1>, scalar_prefetch = 0 : i64, scratch_operands = 1 : i64, tpu.core_type = #tpu.core_type<tc>, window_params = [{transform_indices = @transform_0, window_bounds = array<i64: 16, 32>}, {transform_indices = @transform_1, window_bounds = array<i64: 32, 128>}, {transform_indices = @transform_2, window_bounds = array<i64: 1, 128>}, {transform_indices = @transform_3, window_bounds = array<i64: 128, 32>}, {pipeline_mode = #tpu.pipeline_mode<synchronous>, transform_indices = @transform_4, window_bounds = array<i64: 1, 32>}, {transform_indices = @transform_5, window_bounds = array<i64: 16, 32>}]} {
    %c0_i32 = arith.constant 0 : i32
    %0 = arith.cmpi eq, %arg1, %c0_i32 : i32
    %1 = arith.extui %0 : i1 to i32
    %c0_i32_0 = arith.constant 0 : i32
    %2 = arith.cmpi ne, %1, %c0_i32_0 : i32
    scf.if %2 {
      %cst_19 = arith.constant 0.000000e+00 : f32
      %31 = vector.broadcast %cst_19 : f32 to vector<16x32xf32>
      %c0_20 = arith.constant 0 : index
      %c0_21 = arith.constant 0 : index
      %32 = vector.load %arg8[%c0_20, %c0_21] : memref<16x32xf32, #tpu.memory_space<vmem>>, vector<16x32xf32>
      tpu.vector_store %arg8[%c0_20, %c0_21], %31 {strides = array<i32>} : memref<16x32xf32, #tpu.memory_space<vmem>>, vector<16x32xf32>,
    } else {
    }
    %c0 = arith.constant 0 : index
    %c0_1 = arith.constant 0 : index
    %3 = vector.load %arg2[%c0, %c0_1] : memref<16x32xbf16, #tpu.memory_space<vmem>>, vector<16x32xbf16>
    %c0_2 = arith.constant 0 : index
    %c0_3 = arith.constant 0 : index
    %4 = vector.load %arg3[%c0_2, %c0_3] : memref<32x128xbf16, #tpu.memory_space<vmem>>, vector<32x128xbf16>
    %cst = arith.constant dense<0.000000e+00> : vector<16x128xf32>
    %5 = tpu.matmul %3, %4, %cst {dimension_numbers = #tpu.dot_dimension_numbers<[1], [0], [0], [1], [0, 0, 1, 1], [], []>} : vector<16x32xbf16>, vector<32x128xbf16>, vector<16x128xf32> -> vector<16x128xf32>
    %c0_4 = arith.constant 0 : index
    %c0_5 = arith.constant 0 : index
    %6 = vector.load %arg4[%c0_4, %c0_5] : memref<1x128xf32, #tpu.memory_space<vmem>>, vector<1x128xf32>
    %7 = vector.broadcast %6 : vector<1x128xf32> to vector<16x128xf32>
    %8 = arith.addf %5, %7 : vector<16x128xf32>
    %cst_6 = arith.constant 5.000000e-01 : f32
    %9 = vector.broadcast %cst_6 : f32 to vector<16x128xf32>
    %10 = arith.mulf %9, %8 : vector<16x128xf32>
    %cst_7 = arith.constant 4.471500e-02 : f32
    %11 = vector.broadcast %cst_7 : f32 to vector<16x128xf32>
    %12 = arith.mulf %11, %8 : vector<16x128xf32>
    %13 = arith.mulf %12, %8 : vector<16x128xf32>
    %14 = arith.mulf %13, %8 : vector<16x128xf32>
    %15 = arith.addf %8, %14 : vector<16x128xf32>
    %cst_8 = arith.constant 0.797884583 : f32
    %16 = vector.broadcast %cst_8 : f32 to vector<16x128xf32>
    %17 = arith.mulf %16, %15 : vector<16x128xf32>
    %18 = math.tanh %17 : vector<16x128xf32>
    %cst_9 = arith.constant 1.000000e+00 : f32
    %19 = vector.broadcast %cst_9 : f32 to vector<16x128xf32>
    %20 = arith.addf %19, %18 : vector<16x128xf32>
    %21 = arith.mulf %10, %20 : vector<16x128xf32>
    %c0_10 = arith.constant 0 : index
    %c0_11 = arith.constant 0 : index
    %22 = vector.load %arg8[%c0_10, %c0_11] : memref<16x32xf32, #tpu.memory_space<vmem>>, vector<16x32xf32>
    %23 = arith.truncf %21 : vector<16x128xf32> to vector<16x128xbf16>
    %c0_12 = arith.constant 0 : index
    %c0_13 = arith.constant 0 : index
    %24 = vector.load %arg5[%c0_12, %c0_13] : memref<128x32xbf16, #tpu.memory_space<vmem>>, vector<128x32xbf16>
    %cst_14 = arith.constant dense<0.000000e+00> : vector<16x32xf32>
    %25 = tpu.matmul %23, %24, %cst_14 {dimension_numbers = #tpu.dot_dimension_numbers<[1], [0], [0], [1], [0, 0, 1, 1], [], []>} : vector<16x128xbf16>, vector<128x32xbf16>, vector<16x32xf32> -> vector<16x32xf32>
    %26 = arith.addf %22, %25 : vector<16x32xf32>
    %c0_15 = arith.constant 0 : index
    %c0_16 = arith.constant 0 : index
    %27 = vector.load %arg8[%c0_15, %c0_16] : memref<16x32xf32, #tpu.memory_space<vmem>>, vector<16x32xf32>
    tpu.vector_store %arg8[%c0_15, %c0_16], %26 {strides = array<i32>} : memref<16x32xf32, #tpu.memory_space<vmem>>, vector<16x32xf32>,
    %c0_i32_17 = arith.constant 0 : i32
    %28 = arith.cmpi eq, %arg1, %c0_i32_17 : i32
    %29 = arith.extui %28 : i1 to i32
    %c0_i32_18 = arith.constant 0 : i32
    %30 = arith.cmpi ne, %29, %c0_i32_18 : i32
    scf.if %30 {
      %c0_19 = arith.constant 0 : index
      %c0_20 = arith.constant 0 : index
      %31 = vector.load %arg8[%c0_19, %c0_20] : memref<16x32xf32, #tpu.memory_space<vmem>>, vector<16x32xf32>
      %c0_21 = arith.constant 0 : index
      %c0_22 = arith.constant 0 : index
      %32 = vector.load %arg6[%c0_21, %c0_22] : memref<1x32xf32, #tpu.memory_space<vmem>>, vector<1x32xf32>
      %33 = vector.broadcast %32 : vector<1x32xf32> to vector<16x32xf32>
      %34 = arith.addf %31, %33 : vector<16x32xf32>
      %c0_23 = arith.constant 0 : index
      %c0_24 = arith.constant 0 : index
      %35 = vector.load %arg7[%c0_23, %c0_24] : memref<16x32xf32, #tpu.memory_space<vmem>>, vector<16x32xf32>
      tpu.vector_store %arg7[%c0_23, %c0_24], %34 {strides = array<i32>} : memref<16x32xf32, #tpu.memory_space<vmem>>, vector<16x32xf32>,
    } else {
    }
    return
  }
  func.func @transform_0(%arg0: i32, %arg1: i32) -> (i32, i32) {
    %c0_i32 = arith.constant 0 : i32
    %c0_i32_0 = arith.constant 0 : i32
    return %arg0, %c0_i32 : i32, i32
  }
  func.func @transform_1(%arg0: i32, %arg1: i32) -> (i32, i32) {
    %c0_i32 = arith.constant 0 : i32
    %c0_i32_0 = arith.constant 0 : i32
    return %c0_i32, %arg1 : i32, i32
  }
  func.func @transform_2(%arg0: i32, %arg1: i32) -> (i32, i32) {
    %c0_i32 = arith.constant 0 : i32
    %c0_i32_0 = arith.constant 0 : i32
    return %c0_i32, %arg1 : i32, i32
  }
  func.func @transform_3(%arg0: i32, %arg1: i32) -> (i32, i32) {
    %c0_i32 = arith.constant 0 : i32
    %c0_i32_0 = arith.constant 0 : i32
    return %arg1, %c0_i32 : i32, i32
  }
  func.func @transform_4(%arg0: i32, %arg1: i32) -> (i32, i32) {
    %c0_i32 = arith.constant 0 : i32
    %c0_i32_0 = arith.constant 0 : i32
    %c0_i32_1 = arith.constant 0 : i32
    return %c0_i32, %c0_i32_0 : i32, i32
  }
  func.func @transform_5(%arg0: i32, %arg1: i32) -> (i32, i32) {
    %c0_i32 = arith.constant 0 : i32
    %c0_i32_0 = arith.constant 0 : i32
    return %arg0, %c0_i32 : i32, i32
  }
}

</mosaic_0001>

<bundles_post_ra>
// kernel: gpt2_mlp.1
= control target key start
LH: loop header
LB: loop body
LE: loop exit
PB: predicated region body
PF: predicated region fallthrough
CT: control target
= control target key end

     0   :  { %s383_s0 = inlined_call_operand.vmem [shape: bf16[16,32], index: 0, kind: input, shape index: {}]   ;;  %s384_s1 = inlined_call_operand.vmem [shape: bf16[32,128], index: 1, kind: input, shape index: {}]   ;;  %s385_s2 = inlined_call_operand.vmem [shape: f32[1,128], index: 2, kind: input, shape index: {}]   ;;  %s386_s3 = inlined_call_operand.vmem [shape: bf16[128,32], index: 3, kind: input, shape index: {}]   ;;  %s387_s4 = inlined_call_operand.vmem [shape: f32[1,32], index: 4, kind: input, shape index: {}]   ;;  %s388_s5 = inlined_call_operand.hbm [shape: f32[16,32], index: 5, kind: output, shape index: {}]  }
   0x1   :  { %v255_v0 = vld [vmem:[%s384_s1 + $0x8] sm:$0xff] }
   0x2   :  { %10 = vsyncpa [#allocation4], 0  ;;  %66 = vmatpush.bf16.msra.mxu0 %v255_v0  ;;  %v254_v1 = vld [vmem:[%s384_s1] sm:$0xff]  ;;  %vm26_vm0 = vcmask 261120   ;;  %v263_v3 = vld [vmem:[%s386_s3 + $0x38] sm:$0xff]  ;;  %v300_v15 = vmov 0.0  }
   0x3   :  { %v253_v2 = vld [vmem:[%s383_s0] sm:$0xff]  ;;  %159 = vmatpush.bf16.msra.mxu1 %v263_v3  ;;  %v262_v4 = vld [vmem:[%s386_s3 + $0x30] sm:$0xff]  ;;  %v261_v5 = vld [vmem:[%s386_s3 + $0x28] sm:$0xff]  ;;  %27 = vst.msk [vmem:[#allocation2] sm:$0xff] %vm26_vm0, %v300_v15  ;;  %s301_s15 = smov [#allocation3]   ;;  %s196_s19 = sshll.u32 %s388_s5, 4  ;;  %s197_s19 = int_to_ptr.hbm [resolvable:$true] %s196_s19 }
   0x4   :  { %v260_v6 = vld [vmem:[%s386_s3 + $0x20] sm:$0xff]  ;;  %v259_v7 = vld [vmem:[%s386_s3 + $0x18] sm:$0xff]  ;;  %v258_v8 = vld [vmem:[%s386_s3 + $0x10] sm:$0xff]  ;;  %28 = vst.msk [vmem:[#allocation2 + $0x8] sm:$0xff] %vm26_vm0, %v300_v15  ;;  %s194_s16 = sshll.u32 %s301_s15, 4  ;;  %s303_s20 = smov 8   ;;  %s195_s16 = int_to_ptr.vmem [resolvable:$true] %s194_s16 }
   0x5   :  { %v257_v9 = vld [vmem:[%s386_s3 + $0x8] sm:$0xff]  ;;  %v256_v10 = vld [vmem:[%s386_s3] sm:$0xff] }
   0x6   :  { %67 = vmatpush.bf16.msra.mxu0 %v254_v1  ;;  %v268_v11 = vld [vmem:[%s385_s2] ss:$0 sm:$0xff] }
   0x7   :  { %160 = vmatpush.bf16.msra.mxu1 %v262_v4  ;;  %v269_v40 = vld [vmem:[%s387_s4] ss:$0 sm:$0xff]  ;;  %s302_s4 = smov 128  }
   0x9   :  { %220 = vmatmul.msk.bf16.vlgmr.msra.gmra.mxu0 %vm26_vm0, %v253_v2 }
   0xa   :  { %v92_v36 = vld [vmem:[#allocation2] sm:$0xff] }
   0xb   :  { %161 = vmatpush.bf16.msra.mxu1 %v261_v5  ;;  %v93_v39 = vld [vmem:[#allocation2 + $0x8] sm:$0xff] }
   0xf   :  { %162 = vmatpush.bf16.msra.mxu1 %v260_v6 }
  0x13   :  { %163 = vmatpush.bf16.msra.mxu1 %v259_v7 }
  0x17   :  { %164 = vmatpush.bf16.msra.mxu1 %v258_v8 }
  0x1b   :  { %165 = vmatpush.bf16.msra.mxu1 %v257_v9 }
  0x1f   :  { %166 = vmatpush.bf16.msra.mxu1 %v256_v10 }
  0x86   :  { %v69_v12 = vpop.f32.mrf.mxu0 }
  0x87   :  { %v70_v13 = vadd.f32 %v268_v11, %v69_v12 }
  0x89   :  { %v76_v14 = vmul.f32 0.044715, %v70_v13  ;;  %v74_v30 = vmul.f32 0.5, %v70_v13 }
  0x8b   :  { %v78_v16 = vmul.f32 %v76_v14, %v70_v13 }
  0x8d   :  { %v80_v17 = vmul.f32 %v78_v16, %v70_v13 }
  0x8e   :  { %v71_v18 = vpop.f32.mrf.mxu0 }
  0x8f   :  { %v72_v19 = vadd.f32 %v268_v11, %v71_v18  ;;  %v82_v20 = vadd.f32 %v80_v17, %v70_v13 }
  0x91   :  { %v77_v21 = vmul.f32 0.044715, %v72_v19  ;;  %v84_v23 = vmul.f32 0.7978846, %v82_v20  ;;  %v75_v31 = vmul.f32 0.5, %v72_v19 }
  0x93   :  { %v79_v22 = vmul.f32 %v77_v21, %v72_v19  ;;  %270 = vtanh.f32 %v84_v23 }
  0x95   :  { %v81_v24 = vmul.f32 %v79_v22, %v72_v19 }
  0x97   :  { %v83_v25 = vadd.f32 %v81_v24, %v72_v19 }
  0x99   :  { %v85_v26 = vmul.f32 0.7978846, %v83_v25  ;;  %v271_v27 = vpop.eup %270 }
  0x9a   :  { %v88_v28 = vadd.f32 1.0, %v271_v27 }
  0x9b   :  { %272 = vtanh.f32 %v85_v26 }
  0x9c   :  { %v90_v33 = vmul.f32 %v88_v28, %v74_v30 }
  0xa1   :  { %v273_v29 = vpop.eup %272 }
  0xa2   :  { %v89_v32 = vadd.f32 1.0, %v273_v29 }
  0xa4   :  { %v91_v34 = vmul.f32 %v89_v32, %v75_v31 }
  0xa6   :  { %v94_v35 = vpack.c.bf16 %v91_v34, %v90_v33 }
  0xa8   :  { %167 = vmatmul.bf16.vlgmr.msra.gmra.mxu1 %v94_v35 }
 0x125   :  { %v168_v37 = vpop.f32.mrf.mxu1 }
 0x126   :  { %v173_v38 = vadd.f32 %v168_v37, %v92_v36 }
 0x128   :  { %175 = vst.msk [vmem:[#allocation2] sm:$0xff] %vm26_vm0, %v173_v38 }
 0x12d   :  { %v170_v41 = vpop.f32.mrf.mxu1 }
 0x12e   :  { %v174_v42 = vadd.f32 %v170_v41, %v93_v39 }
 0x12f   :  { %v180_v43 = vld [vmem:[#allocation2] sm:$0xff] }
 0x130   :  { %176 = vst.msk [vmem:[#allocation2 + $0x8] sm:$0xff] %vm26_vm0, %v174_v42  ;;  %v186_v44 = vadd.f32 %v269_v40, %v180_v43 }
 0x132   :  { %188 = vst.msk [vmem:[#allocation3] sm:$0xff] %vm26_vm0, %v186_v44 }
 0x137   :  { %v181_v45 = vld [vmem:[#allocation2 + $0x8] sm:$0xff] }
 0x138   :  { %v187_v46 = vadd.f32 %v269_v40, %v181_v45 }
 0x13a   :  { %189 = vst.msk [vmem:[#allocation3 + $0x8] sm:$0xff] %vm26_vm0, %v187_v46 }
 0x13b   :  { %202 = dma.vmem_to_hbm [thread:$0]  %s195_s16, 256, %s197_s19, [#allocation4], %s302_s4, %s302_s4, %s303_s20  }
 0x13c   :  { %298 = dma.done.wait [#allocation4], 256  }
 0x13d   :  { %299 = vsyncadd [#allocation4], 4294967040 }
 0x13e   :  { %207 = vsyncpa [#allocation4], 1 }

</bundles_post_ra>
